<compile_context>
chip_gen: v5e
topology: v5e:2x2
jax: 0.10.0
libtpu: 0.0.40
codegen_flags: <defaults>
</compile_context>

<pallas_src>
import functools
import math

import jax
import jax.numpy as jnp
from jax.experimental import pallas as pl
from jax.experimental.pallas import tpu as pltpu


def _rmsnorm_kernel(x_ref, w_ref, o_ref, *, eps):
    """Unpacked path: x_ref (TR, D), w_ref (1, D)."""
    x = x_ref[...]
    xf = x.astype(jnp.float32)
    nrm = jnp.sqrt(jnp.sum(xf * xf, axis=-1, keepdims=True))   # (TR, 1), XLU
    inv = pl.reciprocal(nrm + eps)                             # exact, EUP slot
    o_ref[...] = ((x * inv.astype(x.dtype)) * w_ref[...]).astype(o_ref.dtype)


def _rmsnorm_packed_kernel(x_ref, w_ref, seg_ref, o_ref, *, eps):
    """Lane-dense path for D < 128: G = 128//D logical rows per physical row.

    x_ref:   (TR, G*D)   packed activations
    w_ref:   (1,  G*D)   weight tiled G times
    seg_ref: (G*D, G*D)  block-diagonal ones ("same segment" indicator)
    """
    x = x_ref[...]
    xf = x.astype(jnp.float32)
    sq = xf * xf
    # Segmented sum of squares: lane j receives the sum over its own D-wide
    # segment.  One tiny MXU matmul -- the MXU is idle in this kernel.
    seg_sum = jnp.dot(sq, seg_ref[...], preferred_element_type=jnp.float32)
    inv = pl.reciprocal(jnp.sqrt(seg_sum) + eps)               # exact, EUP slot
    o_ref[...] = ((x * inv.astype(x.dtype)) * w_ref[...]).astype(o_ref.dtype)


def _round_up(v, m):
    return (v + m - 1) // m * m


def rmsnorm(x, weight, eps=1e-6, *, block_rows=None,
            target_block_bytes=2 * 1024 * 1024,
            min_pallas_elems=64 * 1024, force_pallas=False):
    """weight * (x / (||x||_2 + eps)) along the last axis (matches the module)."""
    orig_shape = x.shape
    D = orig_shape[-1]
    R = math.prod(orig_shape[:-1]) if len(orig_shape) > 1 else 1
    dtype = x.dtype
    itemsize = jnp.dtype(dtype).itemsize

    # Tiny inputs: the fixed custom-call + pipeline-setup cost dwarfs the work.
    if (R * D < min_pallas_elems) and not force_pallas:
        xf = x.astype(jnp.float32)
        nrm = jnp.sqrt(jnp.sum(xf * xf, axis=-1, keepdims=True))
        return (weight.astype(jnp.float32) * (xf / (nrm + eps))).astype(dtype)

    # Lane-dense repack for small D: pack G rows per physical row so stores are
    # full-width vst instead of masked vst.msk at <100% lane utilization.
    pack = (D < 128) and (128 % D == 0) and (R % (128 // D) == 0)
    # TODO(synk): when R % G != 0 we fall back to the lane-sparse path; padding
    # R up to a multiple of G in the wrapper would cover that case too.
    if pack:
        G = 128 // D
        D_eff, R_eff = G * D, R // G
        x2 = x.reshape(R_eff, D_eff)
        w2 = jnp.tile(weight.astype(dtype), G).reshape(1, D_eff)
        lane = jnp.arange(D_eff)
        seg = (lane[:, None] // D == lane[None, :] // D).astype(jnp.float32)
    else:
        G, D_eff, R_eff = 1, D, R
        x2 = x.reshape(R_eff, D_eff)
        w2 = weight.astype(dtype).reshape(1, D_eff)
        seg = None

    # block_rows from a VMEM/DMA budget: ~2 MiB activation block -> pipelined
    # (2 bufs x (in+out)) footprint ~8 MiB, fits every generation and amortises
    # the ~0.35 us per-step pipeline overhead.
    row_bytes = D_eff * itemsize
    if block_rows is None:
        block_rows = max(8, min(target_block_bytes // row_bytes, 8192))
    block_rows = max(8, (int(block_rows) // 8) * 8)
    block_rows = min(block_rows, _round_up(R_eff, 8))
    # Bandwidth-bound inputs: guarantee >= 2 grid steps so v7x can shard the
    # "parallel" row axis across both TensorCores.
    if R_eff * row_bytes >= (1 << 20):
        while block_rows > 8 and pl.cdiv(R_eff, block_rows) < 2:
            block_rows = max(8, ((block_rows // 2) // 8) * 8)

    grid = (pl.cdiv(R_eff, block_rows),)

    x_spec = pl.BlockSpec((block_rows, D_eff), lambda i: (i, 0))
    w_spec = pl.BlockSpec((1, D_eff), lambda i: (0, 0))        # shared, one DMA
    o_spec = pl.BlockSpec((block_rows, D_eff), lambda i: (i, 0))
    cparams = pltpu.CompilerParams(
        dimension_semantics=("parallel",),                     # row blocks independent
        vmem_limit_bytes=32 * 1024 * 1024)

    if pack:
        out = pl.pallas_call(
            functools.partial(_rmsnorm_packed_kernel, eps=eps),
            out_shape=jax.ShapeDtypeStruct((R_eff, D_eff), dtype),
            grid=grid,
            in_specs=[x_spec, w_spec,
                      pl.BlockSpec((D_eff, D_eff), lambda i: (0, 0))],
            out_specs=o_spec,
            compiler_params=cparams,
        )(x2, w2, seg)
    else:
        out = pl.pallas_call(
            functools.partial(_rmsnorm_kernel, eps=eps),
            out_shape=jax.ShapeDtypeStruct((R_eff, D_eff), dtype),
            grid=grid,
            in_specs=[x_spec, w_spec],
            out_specs=o_spec,
            compiler_params=cparams,
        )(x2, w2)
    return out.reshape(orig_shape)


if __name__ == "__main__":
    key = jax.random.PRNGKey(0)
    k1, k2, k3, k4, k5, k6 = jax.random.split(key, 6)
    eps = 1e-6

    def ref(x, w):
        xf = x.astype(jnp.float32)
        nrm = jnp.sqrt(jnp.sum(xf * xf, axis=-1, keepdims=True))
        return w.astype(jnp.float32) * (xf / (nrm + eps))

    # --- Test 1: module's nominal shape (batch=2, seq=8, d_model=32), f32.
    # D=32 < 128 -> lane-dense packed path (G=4), single grid step.
    x1 = jax.random.normal(k1, (2, 8, 32), dtype=jnp.float32)
    w1 = (1.0 + 0.1 * jax.random.normal(k2, (32,))).astype(jnp.float32)
    o1 = jax.block_until_ready(rmsnorm(x1, w1, eps=eps, force_pallas=True))
    assert o1.shape == x1.shape
    assert jnp.all(jnp.isfinite(o1))
    assert jnp.allclose(o1.astype(jnp.float32), ref(x1, w1),
                        rtol=1e-2, atol=1e-3), \
        float(jnp.max(jnp.abs(o1.astype(jnp.float32) - ref(x1, w1))))

    # --- Test 2: multi-step grid with a ragged last block (cdiv tiling),
    # packed path: (3, 38, 64) -> 57 packed rows of 128 lanes, block_rows=16.
    x2 = jax.random.normal(k3, (3, 38, 64), dtype=jnp.float32)
    w2 = (1.0 + 0.1 * jax.random.normal(k4, (64,))).astype(jnp.float32)
    o2 = jax.block_until_ready(
        rmsnorm(x2, w2, eps=eps, force_pallas=True, block_rows=16))
    assert o2.shape == x2.shape
    assert jnp.all(jnp.isfinite(o2))
    assert jnp.allclose(o2.astype(jnp.float32), ref(x2, w2),
                        rtol=1e-2, atol=1e-3)

    # --- Test 3: bf16, D=160 (>=128, not a multiple of 128) -> unpacked path,
    # f32 sum-of-squares accumulation, bf16 multiplies.
    x3 = jax.random.normal(k5, (2, 7, 160), dtype=jnp.float32).astype(jnp.bfloat16)
    w3 = (1.0 + 0.1 * jax.random.normal(k6, (160,))).astype(jnp.float32)
    o3 = jax.block_until_ready(rmsnorm(x3, w3, eps=eps, force_pallas=True))
    assert o3.shape == x3.shape and o3.dtype == jnp.bfloat16
    assert jnp.all(jnp.isfinite(o3.astype(jnp.float32)))
    assert jnp.allclose(o3.astype(jnp.float32), ref(x3, w3),
                        rtol=4e-2, atol=4e-2)

    # --- Test 4: tiny-input fallback path (no Pallas launch).
    o4 = jax.block_until_ready(rmsnorm(x1, w1, eps=eps))
    assert jnp.allclose(o4, ref(x1, w1), rtol=1e-5, atol=1e-6)

    print("KERNEL_OK")
</pallas_src>

<mosaic_0001>
module attributes {stable_mosaic.version = 11 : i64} {
  func.func @_rmsnorm_packed_kernel(%arg0: i32, %arg1: memref<8x128xf32, #tpu.memory_space<vmem>>, %arg2: memref<1x128xf32, #tpu.memory_space<vmem>>, %arg3: memref<128x128xf32, #tpu.memory_space<vmem>>, %arg4: memref<8x128xf32, #tpu.memory_space<vmem>>) attributes {dimension_semantics = [#tpu.dimension_semantics<parallel>], iteration_bounds = array<i64: 1>, scalar_prefetch = 0 : i64, scratch_operands = 0 : i64, tpu.core_type = #tpu.core_type<tc>, window_params = [{transform_indices = @transform_0, window_bounds = array<i64: 8, 128>}, {pipeline_mode = #tpu.pipeline_mode<synchronous>, transform_indices = @transform_1, window_bounds = array<i64: 1, 128>}, {pipeline_mode = #tpu.pipeline_mode<synchronous>, transform_indices = @transform_2, window_bounds = array<i64: 128, 128>}, {transform_indices = @transform_3, window_bounds = array<i64: 8, 128>}]} {
    %c0 = arith.constant 0 : index
    %c0_0 = arith.constant 0 : index
    %0 = vector.load %arg1[%c0, %c0_0] : memref<8x128xf32, #tpu.memory_space<vmem>>, vector<8x128xf32>
    %1 = arith.mulf %0, %0 : vector<8x128xf32>
    %c0_1 = arith.constant 0 : index
    %c0_2 = arith.constant 0 : index
    %2 = vector.load %arg3[%c0_1, %c0_2] : memref<128x128xf32, #tpu.memory_space<vmem>>, vector<128x128xf32>
    %cst = arith.constant dense<0.000000e+00> : vector<8x128xf32>
    %3 = tpu.matmul %1, %2, %cst {dimension_numbers = #tpu.dot_dimension_numbers<[1], [0], [0], [1], [0, 0, 1, 1], [], []>} : vector<8x128xf32>, vector<128x128xf32>, vector<8x128xf32> -> vector<8x128xf32>
    %4 = math.sqrt %3 : vector<8x128xf32>
    %cst_3 = arith.constant 9.99999997E-7 : f32
    %5 = vector.broadcast %cst_3 : f32 to vector<8x128xf32>
    %6 = arith.addf %4, %5 : vector<8x128xf32>
    %7 = tpu.reciprocal %6 : vector<8x128xf32> -> vector<8x128xf32>
    %8 = arith.mulf %0, %7 : vector<8x128xf32>
    %c0_4 = arith.constant 0 : index
    %c0_5 = arith.constant 0 : index
    %9 = vector.load %arg2[%c0_4, %c0_5] : memref<1x128xf32, #tpu.memory_space<vmem>>, vector<1x128xf32>
    %10 = vector.broadcast %9 : vector<1x128xf32> to vector<8x128xf32>
    %11 = arith.mulf %8, %10 : vector<8x128xf32>
    %c0_6 = arith.constant 0 : index
    %c0_7 = arith.constant 0 : index
    %12 = vector.load %arg4[%c0_6, %c0_7] : memref<8x128xf32, #tpu.memory_space<vmem>>, vector<8x128xf32>
    tpu.vector_store %arg4[%c0_6, %c0_7], %11 {strides = array<i32>} : memref<8x128xf32, #tpu.memory_space<vmem>>, vector<8x128xf32>,
    return
  }
  func.func @transform_0(%arg0: i32) -> (i32, i32) {
    %c0_i32 = arith.constant 0 : i32
    %c0_i32_0 = arith.constant 0 : i32
    return %arg0, %c0_i32 : i32, i32
  }
  func.func @transform_1(%arg0: i32) -> (i32, i32) {
    %c0_i32 = arith.constant 0 : i32
    %c0_i32_0 = arith.constant 0 : i32
    %c0_i32_1 = arith.constant 0 : i32
    return %c0_i32, %c0_i32_0 : i32, i32
  }
  func.func @transform_2(%arg0: i32) -> (i32, i32) {
    %c0_i32 = arith.constant 0 : i32
    %c0_i32_0 = arith.constant 0 : i32
    %c0_i32_1 = arith.constant 0 : i32
    return %c0_i32, %c0_i32_0 : i32, i32
  }
  func.func @transform_3(%arg0: i32) -> (i32, i32) {
    %c0_i32 = arith.constant 0 : i32
    %c0_i32_0 = arith.constant 0 : i32
    return %arg0, %c0_i32 : i32, i32
  }
}

</mosaic_0001>

<bundles_post_ra>
// kernel: tpu_custom_call.1
= control target key start
LH: loop header
LB: loop body
LE: loop exit
PB: predicated region body
PF: predicated region fallthrough
CT: control target
= control target key end

     0   :  { %8 = vsyncpa [#allocation3], 0  ;;  %s313_s0 = inlined_call_operand.hbm [shape: f32[4,128], index: 0, kind: input, shape index: {}]   ;;  %s314_s1 = inlined_call_operand.hbm [shape: f32[1,128], index: 1, kind: input, shape index: {}]   ;;  %s315_s2 = inlined_call_operand.hbm [shape: f32[128,128], index: 2, kind: input, shape index: {}]   ;;  %s316_s3 = inlined_call_operand.hbm [shape: f32[4,128], index: 3, kind: output, shape index: {}]  }
   0x1   :  { %9 = vsyncpa [#allocation6], 0 }
   0x2   :  { %10 = vsyncpa [#allocation4], 0  ;;  %s29_s14 = sshll.u32 %s314_s1, 4  ;;  %s30_s14 = int_to_ptr.hbm [resolvable:$true] %s29_s14 }
   0x3   :  { %14 = vsyncadd [#allocation3], 64  ;;  %s267_s15 = smov [#allocation5]   ;;  %s15_s19 = sshll.u32 %s313_s0, 4  ;;  %s16_s19 = int_to_ptr.hbm [resolvable:$true] %s15_s19 }
   0x4   :  { %s31_s16 = sshll.u32 %s267_s15, 4  ;;  %s268_s20 = smov [#allocation2]   ;;  %s32_s16 = int_to_ptr.vmem [resolvable:$true] %s31_s16 }
   0x5   :  { %34 = dma.hbm_to_vmem [thread:$0]  %s30_s14, 16, %s32_s16, [#allocation6]  }
   0x6   :  { %s17_s21 = sshll.u32 %s268_s20, 4  ;;  %s269_s22 = smov 64   ;;  %s18_s21 = int_to_ptr.vmem [resolvable:$true] %s17_s21 }
   0x7   :  { %s270_s23 = smov 4   ;;  %s39_s25 = sshll.u32 %s315_s2, 4  ;;  %s40_s25 = int_to_ptr.hbm [resolvable:$true] %s39_s25 }
   0x8   :  { %23 = dma.hbm_to_vmem [thread:$0]  %s16_s19, 64, %s18_s21, [#allocation3], %s269_s22, %s269_s22, %s270_s23  }
   0x9   :  { %s271_s26 = smov [#allocation7]   ;;  %s272_s0 = smov 128  }
   0xa   :  { %s41_s27 = sshll.u32 %s271_s26, 4  ;;  %s273_s28 = smov 8   ;;  %s42_s27 = int_to_ptr.vmem [resolvable:$true] %s41_s27 }
   0xb   :  { %47 = dma.hbm_to_vmem [thread:$0]  %s40_s25, 2048, %s42_s27, [#allocation6], %s272_s0, %s272_s0, %s273_s28  }
   0xc   :  { %261 = dma.done.wait [#allocation3], 128  }
   0xd   :  { %262 = vsyncadd [#allocation3], 4294967168 }
   0xe   :  { %263 = dma.done.wait [#allocation6], 2064  }
   0xf   :  { %264 = vsyncadd [#allocation6], 4294965232  ;;  %v77_v0 = vld [vmem:[#allocation7 + $0x78] sm:$0xff]  ;;  %v76_v1 = vld [vmem:[#allocation7 + $0x70] sm:$0xff] }
  0x10   :  { %78 = vmatpush.msra.mxu0 %v77_v0  ;;  %v75_v2 = vld [vmem:[#allocation7 + $0x68] sm:$0xff]  ;;  %v74_v3 = vld [vmem:[#allocation7 + $0x60] sm:$0xff]  ;;  %v73_v4 = vld [vmem:[#allocation7 + $0x58] sm:$0xff] }
  0x11   :  { %v72_v5 = vld [vmem:[#allocation7 + $0x50] sm:$0xff]  ;;  %v71_v6 = vld [vmem:[#allocation7 + $0x48] sm:$0xff]  ;;  %v70_v7 = vld [vmem:[#allocation7 + $0x40] sm:$0xff] }
  0x12   :  { %79 = vmatpush.msra.mxu0 %v76_v1  ;;  %v69_v8 = vld [vmem:[#allocation7 + $0x38] sm:$0xff]  ;;  %v68_v9 = vld [vmem:[#allocation7 + $0x30] sm:$0xff]  ;;  %v67_v10 = vld [vmem:[#allocation7 + $0x28] sm:$0xff] }
  0x13   :  { %v66_v11 = vld [vmem:[#allocation7 + $0x20] sm:$0xff]  ;;  %v65_v12 = vld [vmem:[#allocation7 + $0x18] sm:$0xff]  ;;  %v64_v13 = vld [vmem:[#allocation7 + $0x10] sm:$0xff] }
  0x14   :  { %80 = vmatpush.msra.mxu0 %v75_v2  ;;  %v60_v14 = vld [vmem:[#allocation2] sm:$0xff]  ;;  %v63_v15 = vld [vmem:[#allocation7 + $0x8] sm:$0xff]  ;;  %v62_v16 = vld [vmem:[#allocation7] sm:$0xff] }
  0x15   :  { %v61_v17 = vmul.f32 %v60_v14, %v60_v14  ;;  %v160_v39 = vld [vmem:[#allocation5] ss:$0 sm:$0xff] }
  0x16   :  { %81 = vmatpush.msra.mxu0 %v74_v3 }
  0x18   :  { %82 = vmatpush.msra.mxu0 %v73_v4 }
  0x1a   :  { %83 = vmatpush.msra.mxu0 %v72_v5 }
  0x1c   :  { %84 = vmatpush.msra.mxu0 %v71_v6 }
  0x1e   :  { %85 = vmatpush.msra.mxu0 %v70_v7 }
  0x20   :  { %86 = vmatpush.msra.mxu0 %v69_v8 }
  0x22   :  { %87 = vmatpush.msra.mxu0 %v68_v9 }
  0x24   :  { %88 = vmatpush.msra.mxu0 %v67_v10 }
  0x26   :  { %89 = vmatpush.msra.mxu0 %v66_v11 }
  0x28   :  { %90 = vmatpush.msra.mxu0 %v65_v12 }
  0x2a   :  { %91 = vmatpush.msra.mxu0 %v64_v13 }
  0x2c   :  { %92 = vmatpush.msra.mxu0 %v63_v15 }
  0x2e   :  { %93 = vmatpush.msra.mxu0 %v62_v16 }
  0x2f   :  { %94 = vmatmul.f32.vlgmr.msra.gmra.mxu0 %v61_v17 }
  0xac   :  { %v95_v18 = vpop.f32.mrf.mxu0 }
  0xad   :  { %161 = vrsqrt.f32 %v95_v18  ;;  %vm105_vm0 = vcmp.eq.f32.partialorder %v95_v18, inf  ;;  %v108_v26 = vand.u32 2147483648, %v95_v18  ;;  %vm107_vm1 = vcmp.eq.f32.partialorder %v95_v18, 0.0 }
  0xb3   :  { %v162_v19 = vpop.eup %161 }
  0xb4   :  { %v99_v20 = vmul.f32 %v162_v19, %v95_v18 }
  0xb6   :  { %v100_v21 = vmul.f32 %v162_v19, %v99_v20 }
  0xb8   :  { %v101_v22 = vmul.f32 0.5, %v100_v21 }
  0xba   :  { %v102_v23 = vsub.f32 1.5, %v101_v22 }
  0xbc   :  { %v103_v24 = vmul.f32 %v162_v19, %v102_v23 }
  0xbe   :  { %v104_v25 = vmul.f32 %v103_v24, %v95_v18 }
  0xc0   :  { %v106_v27 = vsel %vm105_vm0, %v95_v18, %v104_v25 }
  0xc1   :  { %v109_v28 = vsel %vm107_vm1, %v108_v26, %v106_v27 }
  0xc2   :  { %v110_v29 = vadd.f32 1e-06, %v109_v28 }
  0xc4   :  { %163 = vrcp.f32 %v110_v29  ;;  %v122_v33 = vand.u32 2147483648, %v110_v29  ;;  %v120_v35 = vand.u32 2147483647, %v110_v29  ;;  %vm116_vm3 = vweird.f32 %v110_v29 }
  0xc6   :  { %v123_v37 = vor.u32 1.1754944e-38, %v122_v33  ;;  %vm121_vm5 = vcmp.eq.f32.partialorder %v120_v35, 8.507059e+37 }
  0xca   :  { %v164_v30 = vpop.eup %163 }
  0xcb   :  { %v112_v31 = vmul.f32 %v164_v30, %v110_v29  ;;  %vm117_vm2 = vweird.f32 %v164_v30 }
  0xcc   :  { %vm118_vm4 = vmor %vm116_vm3, %vm117_vm2 }
  0xcd   :  { %v113_v32 = vsub.f32 1.0, %v112_v31 }
  0xcf   :  { %v114_v34 = vmul.f32 %v164_v30, %v113_v32 }
  0xd1   :  { %v115_v36 = vadd.f32 %v164_v30, %v114_v34 }
  0xd3   :  { %v119_v38 = vsel %vm118_vm4, %v164_v30, %v115_v36 }
  0xd4   :  { %v124_v40 = vsel %vm121_vm5, %v123_v37, %v119_v38 }
  0xd5   :  { %v125_v41 = vmul.f32 %v124_v40, %v60_v14 }
  0xd7   :  { %v130_v42 = vmul.f32 %v160_v39, %v125_v41 }
  0xd9   :  { %131 = vst [vmem:[#allocation8] sm:$0xff] %v130_v42 }
  0xda   :  { %135 = vsyncadd [#allocation4], 64  ;;  %s138_s30 = sshll.u32 %s316_s3, 4  ;;  %s274_s4 = smov [#allocation8]   ;;  %s139_s30 = int_to_ptr.hbm [resolvable:$true] %s138_s30 }
  0xdb   :  { %s136_s5 = sshll.u32 %s274_s4, 4  ;;  %s137_s5 = int_to_ptr.vmem [resolvable:$true] %s136_s5 }
  0xdc   :  { %144 = dma.vmem_to_hbm [thread:$0]  %s137_s5, 64, %s139_s30, [#allocation4], %s269_s22, %s269_s22, %s270_s23  }
  0xdd   :  { %265 = dma.done.wait [#allocation4], 128  }
  0xde   :  { %266 = vsyncadd [#allocation4], 4294967168 }
  0xdf   :  { %149 = vsyncpa [#allocation3], 1 }
  0xe0   :  { %150 = vsyncpa [#allocation6], 1 }
  0xe1   :  { %151 = vsyncpa [#allocation4], 1 }

</bundles_post_ra>
